<compile_context>
chip_gen: v6e
topology: v6e:2x2x1
jax: 0.10.0
libtpu: 0.0.40
codegen_flags: <defaults>
</compile_context>

<pallas_src>
import math

import jax
import jax.numpy as jnp
from jax import lax
from jax.experimental import pallas as pl
from jax.experimental.pallas import tpu as pltpu


# ---------------------------------------------------------------------------
# small helpers
# ---------------------------------------------------------------------------
def _round_up(x, m):
    return ((x + m - 1) // m) * m


def _cdiv(a, b):
    return (a + b - 1) // b


def _pad2d(a, rows, cols):
    r, c = a.shape
    if r == rows and c == cols:
        return a
    return jnp.pad(a, ((0, rows - r), (0, cols - c)))


_VMEM_LIMIT = None


def _get_vmem_limit():
    """Half of physical VMEM (32 MiB on v7x, 64 MiB on v5e/v6e); safe fallback."""
    global _VMEM_LIMIT
    if _VMEM_LIMIT is not None:
        return _VMEM_LIMIT
    limit = 32 * 1024 * 1024
    try:
        info = pltpu.get_tpu_info()
        for attr in ("vmem_capacity_bytes", "vmem_size_bytes", "vmem_bytes"):
            if hasattr(info, attr):
                phys = int(getattr(info, attr))
                if phys > 0:
                    limit = max(32 * 1024 * 1024, phys // 2)
                    break
    except Exception:
        pass
    _VMEM_LIMIT = limit
    return limit


def _choose_row_tiling(M, *, max_tile=512, single_tile_max=256, align=16):
    """Row (M) tiling with minimal padding.

    Small M: one full-height tile padded only to a multiple of 8 (legal: block
    == full array dim).  Larger M: >= 2 near-equal tiles (multiple of 16 rows)
    so the 'parallel' grid axis can be megacore-sharded on v7x.
    Returns (TM, M_pad, nm).
    """
    Ma = _round_up(M, 8)
    if Ma <= single_tile_max:
        return Ma, Ma, 1
    nm = max(2, _cdiv(M, max_tile))
    TM = _round_up(_cdiv(M, nm), align)
    return TM, TM * nm, nm


def _choose_k_tiling(K, *, max_untiled, tile_target):
    """Contraction (K) tiling.

    K <= max_untiled (default 4096): no K grid axis at all — single full-depth
    dot, K padded only to a multiple of 8.  Otherwise: big ~tile_target tiles
    (multiple of 128 lanes) so each (TM, TK) bf16 B-tile is MiB-scale.
    Returns (TK, K_pad, nk).
    """
    K8 = _round_up(K, 8)
    if K8 <= max_untiled:
        return K8, K8, 1
    nk = _cdiv(K8, tile_target)
    TK = _round_up(_cdiv(K8, nk), 128)
    return TK, TK * nk, nk


# ---------------------------------------------------------------------------
# kernels
# ---------------------------------------------------------------------------
def _make_direct_kernel(has_bd, has_bu):
    """out = tanh(X@WsT) [+ tanh(Bd@Yd)] [+ tanh(BuT@Yu)] — 1-D row grid, no scratch."""

    def kernel(*refs):
        refs = list(refs)
        x_ref, wsT_ref = refs.pop(0), refs.pop(0)
        if has_bd:
            bd_ref, yd_ref = refs.pop(0), refs.pop(0)
        if has_bu:
            buT_ref, yu_ref = refs.pop(0), refs.pop(0)
        o_ref = refs.pop(0)

        h = jnp.tanh(jnp.dot(x_ref[...], wsT_ref[...],
                             preferred_element_type=jnp.float32))
        if has_bd:
            h = h + jnp.tanh(jnp.dot(bd_ref[...], yd_ref[...],
                                     preferred_element_type=jnp.float32))
        if has_bu:
            h = h + jnp.tanh(jnp.dot(buT_ref[...], yu_ref[...],
                                     preferred_element_type=jnp.float32))
        o_ref[...] = h.astype(o_ref.dtype)

    return kernel


def _make_ktiled_kernel(has_bd, has_bu, nk, nkd, nku):
    """Same branch sum with the big B@Y contractions accumulated over a K grid
    axis into lane-dense (TM, O_pad) f32 scratch; tanh + sum at the last K step.
    Branches shorter than nk skip their tail K steps (their tiles are not
    re-fetched either: the index_map is clamped, so the block index repeats and
    the DMA is elided)."""

    def kernel(*refs):
        refs = list(refs)
        x_ref, wsT_ref = refs.pop(0), refs.pop(0)
        if has_bd:
            bd_ref, yd_ref = refs.pop(0), refs.pop(0)
        if has_bu:
            buT_ref, yu_ref = refs.pop(0), refs.pop(0)
        o_ref = refs.pop(0)
        accd_ref = refs.pop(0) if has_bd else None
        accu_ref = refs.pop(0) if has_bu else None

        k = pl.program_id(1)

        @pl.when(k == 0)
        def _init():
            if has_bd:
                accd_ref[...] = jnp.zeros_like(accd_ref)
            if has_bu:
                accu_ref[...] = jnp.zeros_like(accu_ref)

        if has_bd:
            def _acc_d():
                accd_ref[...] += jnp.dot(bd_ref[...], yd_ref[...],
                                         preferred_element_type=jnp.float32)
            if nkd < nk:
                pl.when(k < nkd)(_acc_d)
            else:
                _acc_d()

        if has_bu:
            def _acc_u():
                accu_ref[...] += jnp.dot(buT_ref[...], yu_ref[...],
                                         preferred_element_type=jnp.float32)
            if nku < nk:
                pl.when(k < nku)(_acc_u)
            else:
                _acc_u()

        @pl.when(k == nk - 1)
        def _fin():
            h = jnp.tanh(jnp.dot(x_ref[...], wsT_ref[...],
                                 preferred_element_type=jnp.float32))
            if has_bd:
                h = h + jnp.tanh(accd_ref[...])
            if has_bu:
                h = h + jnp.tanh(accu_ref[...])
            o_ref[...] = h.astype(o_ref.dtype)

    return kernel


# ---------------------------------------------------------------------------
# per-dimension fused pallas_call
# ---------------------------------------------------------------------------
def _scnn_dim_call(plan, x_p, yd_p, yu_p):
    has_bd, has_bu = plan["has_bd"], plan["has_bu"]
    TM, M_pad, nm = plan["TM"], plan["M_pad"], plan["nm"]
    O_pad, F, nk = plan["O_pad"], plan["F"], plan["nk"]

    inputs = [x_p, plan["wsT"]]
    if has_bd:
        inputs += [plan["bd"], yd_p]
    if has_bu:
        inputs += [plan["buT"], yu_p]

    if nk == 1:
        grid = (nm,)
        in_specs = [pl.BlockSpec((TM, F), lambda m: (m, 0)),
                    pl.BlockSpec((F, O_pad), lambda m: (0, 0))]
        if has_bd:
            in_specs += [pl.BlockSpec((TM, plan["Kd_pad"]), lambda m: (m, 0)),
                         pl.BlockSpec((plan["Kd_pad"], O_pad), lambda m: (0, 0))]
        if has_bu:
            in_specs += [pl.BlockSpec((TM, plan["Ku_pad"]), lambda m: (m, 0)),
                         pl.BlockSpec((plan["Ku_pad"], O_pad), lambda m: (0, 0))]
        out_specs = pl.BlockSpec((TM, O_pad), lambda m: (m, 0))
        scratch = []
        dims_sem = ("parallel",)
        kernel = _make_direct_kernel(has_bd, has_bu)
    else:
        nkd = plan.get("nkd", 1)
        nku = plan.get("nku", 1)
        grid = (nm, nk)
        in_specs = [pl.BlockSpec((TM, F), lambda m, k: (m, 0)),
                    pl.BlockSpec((F, O_pad), lambda m, k: (0, 0))]
        if has_bd:
            if nkd < nk:
                bd_map = lambda m, k, _n=nkd: (m, jnp.minimum(k, _n - 1))
                yd_map = lambda m, k, _n=nkd: (jnp.minimum(k, _n - 1), 0)
            else:
                bd_map = lambda m, k: (m, k)
                yd_map = lambda m, k: (k, 0)
            in_specs += [pl.BlockSpec((TM, plan["TKd"]), bd_map),
                         pl.BlockSpec((plan["TKd"], O_pad), yd_map)]
        if has_bu:
            if nku < nk:
                bu_map = lambda m, k, _n=nku: (m, jnp.minimum(k, _n - 1))
                yu_map = lambda m, k, _n=nku: (jnp.minimum(k, _n - 1), 0)
            else:
                bu_map = lambda m, k: (m, k)
                yu_map = lambda m, k: (k, 0)
            in_specs += [pl.BlockSpec((TM, plan["TKu"]), bu_map),
                         pl.BlockSpec((plan["TKu"], O_pad), yu_map)]
        out_specs = pl.BlockSpec((TM, O_pad), lambda m, k: (m, 0))
        scratch = []
        if has_bd:
            scratch.append(pltpu.VMEM((TM, O_pad), jnp.float32))
        if has_bu:
            scratch.append(pltpu.VMEM((TM, O_pad), jnp.float32))
        dims_sem = ("parallel", "arbitrary")
        kernel = _make_ktiled_kernel(has_bd, has_bu, nk, nkd, nku)

    # --- advisory cost estimate ------------------------------------------------
    nb = int(has_bd) + int(has_bu)
    flops = 2 * M_pad * F * O_pad
    if has_bd:
        flops += 2 * M_pad * plan["Kd_pad"] * O_pad
    if has_bu:
        flops += 2 * M_pad * plan["Ku_pad"] * O_pad
    refetch = 1 if nk == 1 else nm   # Y blocks re-streamed per row tile when K-tiled
    bytes_accessed = (int(x_p.size) * x_p.dtype.itemsize
                      + int(plan["wsT"].size) * plan["wsT"].dtype.itemsize
                      + M_pad * O_pad * 4)
    if has_bd:
        bytes_accessed += int(plan["bd"].size) * plan["bd"].dtype.itemsize
        bytes_accessed += refetch * int(yd_p.size) * yd_p.dtype.itemsize
    if has_bu:
        bytes_accessed += int(plan["buT"].size) * plan["buT"].dtype.itemsize
        bytes_accessed += refetch * int(yu_p.size) * yu_p.dtype.itemsize
    cost = pl.CostEstimate(flops=int(flops),
                           transcendentals=int(M_pad * O_pad * (1 + nb)),
                           bytes_accessed=int(bytes_accessed))

    out_pad = pl.pallas_call(
        kernel,
        out_shape=jax.ShapeDtypeStruct((M_pad, O_pad), jnp.float32),
        grid=grid,
        in_specs=in_specs,
        out_specs=out_specs,
        scratch_shapes=scratch,
        compiler_params=pltpu.CompilerParams(
            dimension_semantics=dims_sem,
            vmem_limit_bytes=_get_vmem_limit(),
        ),
        cost_estimate=cost,
    )(*inputs)
    return out_pad


# ---------------------------------------------------------------------------
# prepare-once (topology + weights) / apply-per-forward
# ---------------------------------------------------------------------------
def prepare_scnn_layer(params, X, B, dimensions, *, compute_dtype=jnp.bfloat16,
                       max_k_untiled=4096, k_tile_target=None):
    """One-time preprocessing: tile plans, padded+cast boundary matrices
    (incl. the pre-transposed B[i-1].T for the h_bu branch) and pre-transposed
    skip weights.  The topology is fixed, so repeated forwards reuse this."""
    cdt = compute_dtype
    if k_tile_target is None:
        k_tile_target = 4096 if _get_vmem_limit() >= 64 * 1024 * 1024 else 2048
    F = X[0].shape[1]
    prepared = []
    for i in range(dimensions):
        w_s = params["s"][i]
        O = w_s.shape[0]
        M = X[i].shape[0]
        has_bd = (B[i] is not None) and (i < dimensions - 1)
        # Faithful to the PyTorch source: the h_bu gate tests B[i+1] but the
        # branch consumes B[i-1].T and X[i-1].
        has_bu = (i < dimensions - 1) and (B[i + 1] is not None) and (i > 0)

        TM, M_pad, nm = _choose_row_tiling(M)
        O_pad = _round_up(O, 128)
        plan = dict(i=i, M=M, O=O, F=F, TM=TM, M_pad=M_pad, nm=nm, O_pad=O_pad,
                    has_bd=has_bd, has_bu=has_bu, nk=1, bd=None, buT=None)
        plan["wsT"] = _pad2d(jnp.transpose(w_s).astype(cdt), F, O_pad)
        if has_bd:
            Kd = X[i + 1].shape[0]
            TKd, Kd_pad, nkd = _choose_k_tiling(Kd, max_untiled=max_k_untiled,
                                                tile_target=k_tile_target)
            plan.update(Kd=Kd, TKd=TKd, Kd_pad=Kd_pad, nkd=nkd)
            plan["bd"] = _pad2d(B[i].astype(cdt), M_pad, Kd_pad)
        if has_bu:
            Ku = X[i - 1].shape[0]
            TKu, Ku_pad, nku = _choose_k_tiling(Ku, max_untiled=max_k_untiled,
                                                tile_target=k_tile_target)
            plan.update(Ku=Ku, TKu=TKu, Ku_pad=Ku_pad, nku=nku)
            plan["buT"] = _pad2d(jnp.transpose(B[i - 1]).astype(cdt), M_pad, Ku_pad)
        if has_bd or has_bu:
            plan["nk"] = max(plan.get("nkd", 1), plan.get("nku", 1))
        prepared.append(plan)
    return prepared


def scnn_apply_prepared(prepared, params, X, *, compute_dtype=jnp.bfloat16):
    """Per-forward work: tiny X@W^T projections (wrapper XLA, reference
    association preserved), cheap activation padding, then one fused
    pallas_call per simplex dimension."""
    cdt = compute_dtype
    hi = lax.Precision.HIGHEST
    out = []
    for plan in prepared:
        i = plan["i"]
        x_p = _pad2d(X[i].astype(cdt), plan["M_pad"], plan["F"])
        yd_p = yu_p = None
        if plan["has_bd"]:
            yd = jnp.dot(X[i + 1], params["b_d"][i].T, precision=hi)   # (Kd, O) tiny
            yd_p = _pad2d(yd.astype(cdt), plan["Kd_pad"], plan["O_pad"])
        if plan["has_bu"]:
            yu = jnp.dot(X[i - 1], params["b_u"][i].T, precision=hi)   # (Ku, O) tiny
            yu_p = _pad2d(yu.astype(cdt), plan["Ku_pad"], plan["O_pad"])
        out_pad = _scnn_dim_call(plan, x_p, yd_p, yu_p)
        out.append(out_pad[: plan["M"], : plan["O"]])
    return out


# ---------------------------------------------------------------------------
# SCNNLayer parameters + forward (mirrors the PyTorch control flow exactly)
# ---------------------------------------------------------------------------
def init_scnn_params(key, input_size, output_size, dimensions):
    # nn.Linear(input_size, output_size, bias=False): weight (O, F), U(-1/sqrt(F), 1/sqrt(F))
    bound = 1.0 / math.sqrt(input_size)
    params = {}
    for name in ("b_d", "b_u", "s"):
        ws = []
        for _ in range(dimensions):
            key, sub = jax.random.split(key)
            ws.append(jax.random.uniform(sub, (output_size, input_size),
                                         jnp.float32, -bound, bound))
        params[name] = ws
    return params


def scnn_layer_forward(params, X, B, dimensions, *, use_pallas=True,
                       compute_dtype=jnp.bfloat16, prepared=None,
                       max_k_untiled=4096, k_tile_target=None):
    if not use_pallas:   # pure-JAX f32 reference (HIGHEST precision matmuls)
        hi = lax.Precision.HIGHEST
        out = []
        for i in range(dimensions):
            h = jnp.tanh(jnp.dot(X[i], params["s"][i].T, precision=hi))
            if B[i] is not None and i < dimensions - 1:
                h = h + jnp.tanh(jnp.dot(
                    B[i], jnp.dot(X[i + 1], params["b_d"][i].T, precision=hi),
                    precision=hi))
            if i < dimensions - 1 and B[i + 1] is not None and i > 0:
                h = h + jnp.tanh(jnp.dot(
                    B[i - 1].T, jnp.dot(X[i - 1], params["b_u"][i].T, precision=hi),
                    precision=hi))
            out.append(h)
        return out
    if prepared is None:
        prepared = prepare_scnn_layer(params, X, B, dimensions,
                                      compute_dtype=compute_dtype,
                                      max_k_untiled=max_k_untiled,
                                      k_tile_target=k_tile_target)
    return scnn_apply_prepared(prepared, params, X, compute_dtype=compute_dtype)


# ---------------------------------------------------------------------------
# Demo / self-test
# ---------------------------------------------------------------------------
def _build_demo_complex(key, n_simplices, input_size, none_dims=(3,)):
    dims = len(n_simplices)
    keys = jax.random.split(key, 2 * dims)
    X = [jax.random.normal(keys[i], (n_simplices[i], input_size), jnp.float32)
         for i in range(dims)]
    B = []
    for i in range(dims):
        kb = keys[dims + i]
        if i in none_dims:
            B.append(None)
        elif i == dims - 1:
            # content never read (only its not-None-ness gates h_bu at i = dims-2)
            B.append(0.3 * jax.random.normal(kb, (n_simplices[i], 2), jnp.float32))
        else:
            B.append(0.3 * jax.random.normal(
                kb, (n_simplices[i], n_simplices[i + 1]), jnp.float32))
    return X, B


if __name__ == "__main__":
    key = jax.random.PRNGKey(0)
    dimensions = 5
    input_size = 16
    output_size = 32

    key, kp, kc1, kc2 = jax.random.split(key, 4)
    params = init_scnn_params(kp, input_size, output_size, dimensions)

    # ---- config 1: default tiling (untiled-K fast path, multi-row-tile for n=300)
    n1 = [20, 300, 40, 30, 10]
    X1, B1 = _build_demo_complex(kc1, n1, input_size)

    ref1 = scnn_layer_forward(params, X1, B1, dimensions, use_pallas=False)

    # bf16 MXU path, prepare-once (cached B preprocessing) + apply
    prep = prepare_scnn_layer(params, X1, B1, dimensions, compute_dtype=jnp.bfloat16)
    out_bf16 = scnn_apply_prepared(prep, params, X1, compute_dtype=jnp.bfloat16)
    out_bf16 = [jax.block_until_ready(o) for o in out_bf16]

    # f32 path
    out_f32 = scnn_layer_forward(params, X1, B1, dimensions, use_pallas=True,
                                 compute_dtype=jnp.float32)
    out_f32 = [jax.block_until_ready(o) for o in out_f32]

    for i, (o, r) in enumerate(zip(out_bf16, ref1)):
        assert o.shape == r.shape == (n1[i], output_size)
        err = float(jnp.max(jnp.abs(o - r)))
        assert jnp.allclose(o, r, atol=5e-2, rtol=5e-2), \
            f"dim {i}: bf16 path mismatch, max abs diff {err}"
    for i, (o, r) in enumerate(zip(out_f32, ref1)):
        err = float(jnp.max(jnp.abs(o - r)))
        assert jnp.allclose(o, r, atol=1e-2, rtol=1e-2), \
            f"dim {i}: f32 path mismatch, max abs diff {err}"

    # ---- config 2: stress-test the K-tiled 2-D-grid path (forced small K tiles,
    #      exercises per-branch K padding + clamped index_map + accumulators)
    n2 = [20, 600, 260, 40, 10]
    X2, B2 = _build_demo_complex(kc2, n2, input_size)
    ref2 = scnn_layer_forward(params, X2, B2, dimensions, use_pallas=False)
    out_kt = scnn_layer_forward(params, X2, B2, dimensions, use_pallas=True,
                                compute_dtype=jnp.float32,
                                max_k_untiled=256, k_tile_target=256)
    out_kt = [jax.block_until_ready(o) for o in out_kt]
    for i, (o, r) in enumerate(zip(out_kt, ref2)):
        assert o.shape == r.shape == (n2[i], output_size)
        err = float(jnp.max(jnp.abs(o - r)))
        assert jnp.allclose(o, r, atol=1e-2, rtol=1e-2), \
            f"dim {i}: K-tiled path mismatch, max abs diff {err}"

    print("KERNEL_OK")
</pallas_src>

<mosaic_0001>
module attributes {stable_mosaic.version = 11 : i64} {
  func.func @kernel(%arg0: i32, %arg1: memref<24x16xbf16, #tpu.memory_space<vmem>>, %arg2: memref<16x128xbf16, #tpu.memory_space<vmem>>, %arg3: memref<24x304xbf16, #tpu.memory_space<vmem>>, %arg4: memref<304x128xbf16, #tpu.memory_space<vmem>>, %arg5: memref<24x128xf32, #tpu.memory_space<vmem>>) attributes {dimension_semantics = [#tpu.dimension_semantics<parallel>], iteration_bounds = array<i64: 1>, scalar_prefetch = 0 : i64, scratch_operands = 0 : i64, tpu.core_type = #tpu.core_type<tc>, window_params = [{transform_indices = @transform_0, window_bounds = array<i64: 24, 16>}, {pipeline_mode = #tpu.pipeline_mode<synchronous>, transform_indices = @transform_1, window_bounds = array<i64: 16, 128>}, {transform_indices = @transform_2, window_bounds = array<i64: 24, 304>}, {pipeline_mode = #tpu.pipeline_mode<synchronous>, transform_indices = @transform_3, window_bounds = array<i64: 304, 128>}, {transform_indices = @transform_4, window_bounds = array<i64: 24, 128>}]} {
    %c0 = arith.constant 0 : index
    %c0_0 = arith.constant 0 : index
    %0 = vector.load %arg1[%c0, %c0_0] : memref<24x16xbf16, #tpu.memory_space<vmem>>, vector<24x16xbf16>
    %c0_1 = arith.constant 0 : index
    %c0_2 = arith.constant 0 : index
    %1 = vector.load %arg2[%c0_1, %c0_2] : memref<16x128xbf16, #tpu.memory_space<vmem>>, vector<16x128xbf16>
    %cst = arith.constant dense<0.000000e+00> : vector<24x128xf32>
    %2 = tpu.matmul %0, %1, %cst {dimension_numbers = #tpu.dot_dimension_numbers<[1], [0], [0], [1], [0, 0, 1, 1], [], []>} : vector<24x16xbf16>, vector<16x128xbf16>, vector<24x128xf32> -> vector<24x128xf32>
    %3 = math.tanh %2 : vector<24x128xf32>
    %c0_3 = arith.constant 0 : index
    %c0_4 = arith.constant 0 : index
    %4 = vector.load %arg3[%c0_3, %c0_4] : memref<24x304xbf16, #tpu.memory_space<vmem>>, vector<24x304xbf16>
    %c0_5 = arith.constant 0 : index
    %c0_6 = arith.constant 0 : index
    %5 = vector.load %arg4[%c0_5, %c0_6] : memref<304x128xbf16, #tpu.memory_space<vmem>>, vector<304x128xbf16>
    %cst_7 = arith.constant dense<0.000000e+00> : vector<24x128xf32>
    %6 = tpu.matmul %4, %5, %cst_7 {dimension_numbers = #tpu.dot_dimension_numbers<[1], [0], [0], [1], [0, 0, 1, 1], [], []>} : vector<24x304xbf16>, vector<304x128xbf16>, vector<24x128xf32> -> vector<24x128xf32>
    %7 = math.tanh %6 : vector<24x128xf32>
    %8 = arith.addf %3, %7 : vector<24x128xf32>
    %c0_8 = arith.constant 0 : index
    %c0_9 = arith.constant 0 : index
    %9 = vector.load %arg5[%c0_8, %c0_9] : memref<24x128xf32, #tpu.memory_space<vmem>>, vector<24x128xf32>
    tpu.vector_store %arg5[%c0_8, %c0_9], %8 {strides = array<i32>} : memref<24x128xf32, #tpu.memory_space<vmem>>, vector<24x128xf32>,
    return
  }
  func.func @transform_0(%arg0: i32) -> (i32, i32) {
    %c0_i32 = arith.constant 0 : i32
    %c0_i32_0 = arith.constant 0 : i32
    return %arg0, %c0_i32 : i32, i32
  }
  func.func @transform_1(%arg0: i32) -> (i32, i32) {
    %c0_i32 = arith.constant 0 : i32
    %c0_i32_0 = arith.constant 0 : i32
    %c0_i32_1 = arith.constant 0 : i32
    return %c0_i32, %c0_i32_0 : i32, i32
  }
  func.func @transform_2(%arg0: i32) -> (i32, i32) {
    %c0_i32 = arith.constant 0 : i32
    %c0_i32_0 = arith.constant 0 : i32
    return %arg0, %c0_i32 : i32, i32
  }
  func.func @transform_3(%arg0: i32) -> (i32, i32) {
    %c0_i32 = arith.constant 0 : i32
    %c0_i32_0 = arith.constant 0 : i32
    %c0_i32_1 = arith.constant 0 : i32
    return %c0_i32, %c0_i32_0 : i32, i32
  }
  func.func @transform_4(%arg0: i32) -> (i32, i32) {
    %c0_i32 = arith.constant 0 : i32
    %c0_i32_0 = arith.constant 0 : i32
    return %arg0, %c0_i32 : i32, i32
  }
}

</mosaic_0001>

<bundles_post_ra>
// kernel: tpu_custom_call.1
= control target key start
LH: loop header
LB: loop body
LE: loop exit
PB: predicated region body
PF: predicated region fallthrough
CT: control target
= control target key end

     0   :  { %9 = vsyncpa [#allocation3], 0  ;;  %s689_s0 = inlined_call_operand.vmem [shape: bf16[24,16], index: 0, kind: input, shape index: {}]   ;;  %s690_s1 = inlined_call_operand.vmem [shape: bf16[16,128], index: 1, kind: input, shape index: {}]   ;;  %s691_s2 = inlined_call_operand.hbm [shape: bf16[24,304], index: 2, kind: input, shape index: {}]   ;;  %s692_s3 = inlined_call_operand.hbm [shape: bf16[304,128], index: 3, kind: input, shape index: {}]   ;;  %s693_s4 = inlined_call_operand.hbm [shape: f32[24,128], index: 4, kind: output, shape index: {}]  }
   0x1   :  { %10 = vsyncpa [#allocation6], 0 }
   0x2   :  { %11 = vsyncpa [#allocation4], 0  ;;  %s637_s15 = smov [#allocation2]  }
   0x3   :  { %s21_s16 = sshll.u32 %s637_s15, 4  ;;  %s22_s16 = int_to_ptr.vmem [resolvable:$true] %s21_s16 }
   0x4   :  { %s579_s17 = scalar_lea.vmem %s22_s16, 576  ;;  %p584_p1 = scmp.lt.s32.totalorder %s22_s16, %s22_s16 }
   0x5   :  { %p580_p0 = scmp.ne.s32.totalorder %s22_s16, %s579_s17  ;;  %p585_p2 = scmp.lt.s32.totalorder %s579_s17, %s579_s17 }
   0x7   :  { %p586_p3 = por %p585_p2, %p584_p1 }
   0x9   :  { %p587_p4 = pnand %p586_p3, %p580_p0 }
   0xb   :  { %590 = shalt.err (!%p587_p4)
}
   0xc   :  { %s638_s18 = smov 192   ;;  %s639_s19 = smov 12  }
   0xd   :  { %27 = dma.hbm_to_vmem [thread:$0]  %s691_s2, 576, %s22_s16, [#allocation3], %s638_s18, %s638_s18, %s639_s19  }
   0xe   :  { %s640_s22 = smov [#allocation5]  }
   0xf   :  { %s33_s23 = sshll.u32 %s640_s22, 4  ;;  %s34_s23 = int_to_ptr.vmem [resolvable:$true] %s33_s23 }
  0x10   :  { %s599_s24 = scalar_lea.vmem %s34_s23, 2432  ;;  %p604_p6 = scmp.lt.s32.totalorder %s34_s23, %s34_s23 }
  0x11   :  { %p600_p5 = scmp.ne.s32.totalorder %s34_s23, %s599_s24  ;;  %p605_p7 = scmp.lt.s32.totalorder %s599_s24, %s599_s24 }
  0x13   :  { %p606_p8 = por %p605_p7, %p604_p6 }
  0x15   :  { %p607_p9 = pnand %p606_p8, %p600_p5 }
  0x17   :  { %610 = shalt.err (!%p607_p9)
}
  0x18   :  { %s641_s25 = smov 64   ;;  %s642_s26 = smov 4  }
  0x19   :  { %39 = dma.hbm_to_vmem [thread:$0]  %s692_s3, 2432, %s34_s23, [#allocation6], %s641_s25, %s641_s25, %s642_s26  }
  0x1a   :  { %631 = dma.done.wait [#allocation3], 576  }
  0x1b   :  { %632 = vsyncadd [#allocation3], 4294966720 }
  0x1c   :  { %633 = dma.done.wait [#allocation6], 2432  }
  0x1d   :  { %634 = vsyncadd [#allocation6], 4294964864  ;;  %v530_v0 = vld [vmem:[#allocation5 + $0x78] sm:$0xff]   ;;  %v532_v2 = vld [vmem:[#allocation5 + $0x70] sm:$0xff]   ;;  %vm66_vm0 = vcmask 130048   ;;  %vm307_vm1 = vcmask 392192  }
  0x1e   :  { %v531_v1 = vld [vmem:[#allocation5 + $0x38] sm:$0xff]   ;;  %472 = vmatprep.subr.bf16.mxu1 %v530_v0  ;;  %v533_v3 = vld [vmem:[#allocation5 + $0x30] sm:$0xff]   ;;  %v534_v4 = vld [vmem:[#allocation5 + $0x68] sm:$0xff]  }
  0x1f   :  { %473 = vmatpush3.bf16.msra.mxu1 %v531_v1  ;;  %v535_v5 = vld [vmem:[#allocation5 + $0x28] sm:$0xff]   ;;  %v536_v6 = vld [vmem:[#allocation5 + $0x60] sm:$0xff]   ;;  %v539_v10 = vld [vmem:[#allocation5 + $0x58] sm:$0xff]  }
  0x20   :  { %474 = vmatprep.subr.bf16.mxu1 %v532_v2  ;;  %v538_v7 = vld [vmem:[%s690_s1] sm:$0xff]   ;;  %v543_v11 = vld [vmem:[#allocation5 + $0x90] sm:$0xff]   ;;  %v544_v12 = vld [vmem:[%s689_s0 + $0x8] ss:$0 sps:$4 sm:$0xff]  }
  0x21   :  { %v537_v8 = vld [vmem:[#allocation5 + $0x20] sm:$0xff]   ;;  %505 = vmatprep.subr.bf16.mxu0 %v538_v7  ;;  %v540_v13 = vld [vmem:[#allocation5 + $0x18] sm:$0xff]   ;;  %v542_v14 = vld [vmem:[#allocation5 + $0x50] sm:$0xff]  }
  0x22   :  { %506 = vmatpush3.bf16.msra.mxu0 %v538_v7  ;;  %v541_v9 = vld [vmem:[%s689_s0] sm:$0xff]   ;;  %v547_v15 = vld [vmem:[#allocation5 + $0x88] sm:$0xff]   ;;  %v545_v16 = vld [vmem:[#allocation5 + $0x10] sm:$0xff]   ;;  %s643_s0 = smov [#allocation7]  }
  0x23   :  { %475 = vmatpush3.bf16.msra.mxu1 %v533_v3  ;;  %507 = vmatprep.mubr.msk.bf16.mxu0 %vm66_vm0, %v541_v9  ;;  %v546_v17 = vld [vmem:[#allocation5 + $0x48] sm:$0xff]   ;;  %v550_v18 = vld [vmem:[#allocation5 + $0x80] sm:$0xff]   ;;  %v556_v23 = vld [vmem:[#allocation2 + $0x20] ss:$0 sps:$4 sm:$0xff]   ;;  %s424_s1 = sshll.u32 %s643_s0, 4  ;;  %s425_s1 = int_to_ptr.vmem [resolvable:$true] %s424_s1 }
  0x24   :  { %476 = vmatprep.subr.bf16.mxu1 %v534_v4  ;;  %511 = vmatprep.subr.bf16.mxu0 %v543_v11  ;;  %v548_v19 = vld [vmem:[#allocation5 + $0x8] sm:$0xff]   ;;  %v555_v21 = vld [vmem:[#allocation2 + $0x8] ss:$12 sps:$4 sm:$0xff]   ;;  %v128_v25 = vld [vmem:[#allocation2 + $0x18] sm:$0xff]  ;;  %s611_s7 = scalar_lea.vmem %s425_s1, 384  ;;  %p616_p11 = scmp.lt.s32.totalorder %s425_s1, %s425_s1 }
  0x25   :  { %508 = vmatmul.mubr.msk.bf16.vlgmr.msra.gmra.mxu0 %vm66_vm0, %v544_v12  ;;  %v554_v20 = vld [vmem:[#allocation2 + $0x4] ss:$12 sps:$4 sm:$0xff]   ;;  %v552_v26 = vld [vmem:[#allocation2] ss:$12 sps:$4 sm:$0xff]   ;;  %v446_v27 = vcombine.high %v128_v25, %v128_v25  ;;  %v445_v28 = vcombine.low %v128_v25, %v128_v25  ;;  %p612_p10 = scmp.ne.s32.totalorder %s425_s1, %s611_s7  ;;  %p617_p12 = scmp.lt.s32.totalorder %s611_s7, %s611_s7 }
  0x26   :  { %512 = vmatpush3.bf16.msra.mxu0 %v543_v11  ;;  %v549_v22 = vld [vmem:[#allocation5 + $0x40] sm:$0xff]   ;;  %346 = vmatprep.mubr.bf16.mxu1 %v554_v20 }
  0x27   :  { %477 = vmatpush3.bf16.msra.mxu1 %v535_v5  ;;  %513 = vmatprep.subr.bf16.mxu0 %v547_v15  ;;  %v551_v24 = vld [vmem:[#allocation5] sm:$0xff]   ;;  %p618_p13 = por %p617_p12, %p616_p11 }
  0x28   :  { %478 = vmatprep.subr.bf16.mxu1 %v536_v6  ;;  %517 = vmatprep.mubr.msk.bf16.mxu0 %vm307_vm1, %v555_v21 }
  0x29   :  { %p619_p0 = pnand %p618_p13, %p612_p10 }
  0x2a   :  { %514 = vmatpush3.bf16.msra.mxu0 %v547_v15 }
  0x2b   :  { %479 = vmatpush3.bf16.msra.mxu1 %v537_v8  ;;  %515 = vmatprep.subr.bf16.mxu0 %v550_v18 }
  0x2c   :  { %480 = vmatprep.subr.bf16.mxu1 %v539_v10 }
  0x2e   :  { %516 = vmatpush3.bf16.msra.mxu0 %v550_v18 }
  0x2f   :  { %481 = vmatpush3.bf16.msra.mxu1 %v540_v13 }
  0x30   :  { %482 = vmatprep.subr.bf16.mxu1 %v542_v14 }
  0x31   :  { %518 = vmatmul.mubr.msk.bf16.vlgmr.msra.gmra.mxu0 %vm307_vm1, %v556_v23 }
  0x33   :  { %483 = vmatpush3.bf16.msra.mxu1 %v545_v16 }
  0x34   :  { %484 = vmatprep.subr.bf16.mxu1 %v546_v17 }
  0x37   :  { %485 = vmatpush3.bf16.msra.mxu1 %v548_v19 }
  0x38   :  { %486 = vmatprep.subr.bf16.mxu1 %v549_v22 }
  0x3b   :  { %487 = vmatpush3.bf16.msra.mxu1 %v551_v24 }
  0x3e   :  { %347 = vmatmul.mubr.bf16.vlgmr.msra.gmra.mxu1 %v552_v26 }
  0x3f   :  { %354 = vmatprep.mubr.bf16.mxu1 %v446_v27 }
  0x46   :  { %355 = vmatmul.mubr.bf16.gmra.mxu1 %v445_v28 }
  0xe5   :  { %v509_v29 = vpop.f32.mrf.mxu0 }
  0xe7   :  { %v107_v30 = vpop.f32.mrf.mxu0 }
  0xe8   :  { %559 = vtanh.f32 %v107_v30 }
  0xe9   :  { %v510_v31 = vpop.f32.mrf.mxu0 }
  0xeb   :  { %v110_v32 = vpop.f32.mrf.mxu0 }
  0xf1   :  { %v519_v33 = vpop.f32.mrf.mxu0 }
  0xf3   :  { %v396_v34 = vpop.f32.mrf.mxu0 }
  0xf5   :  { %v520_v35 = vpop.f32.mrf.mxu0  ;;  %v560_v51 = vpop.eup %559 }
  0xf7   :  { %v399_v43 = vpop.f32.mrf.mxu0 }
  0xfe   :  { %v488_v36 = vpop.f32.mrf.mxu1 }
 0x100   :  { %v489_v37 = vpop.f32.mrf.mxu1 }
 0x101   :  { %v490_v38 = vadd.f32 %v489_v37, %v488_v36 }
 0x102   :  { %v491_v39 = vpop.f32.mrf.mxu1 }
 0x103   :  { %v397_v40 = vadd.f32 %v490_v38, %v396_v34 }
 0x104   :  { %v492_v41 = vpop.f32.mrf.mxu1 }
 0x105   :  { %561 = vtanh.f32 %v397_v40  ;;  %v493_v42 = vadd.f32 %v492_v41, %v491_v39 }
 0x106   :  { %v494_v44 = vpop.f32.mrf.mxu1  ;;  %563 = vtanh.f32 %v110_v32 }
 0x107   :  { %v400_v45 = vadd.f32 %v493_v42, %v399_v43 }
 0x108   :  { %v495_v46 = vpop.f32.mrf.mxu1 }
 0x109   :  { %565 = vtanh.f32 %v400_v45  ;;  %v496_v47 = vadd.f32 %v495_v46, %v494_v44 }
 0x10a   :  { %v497_v48 = vpop.f32.mrf.mxu1  ;;  %567 = vtanh.f32 %v509_v29 }
 0x10b   :  { %v405_v49 = vadd.f32 %v519_v33, %v496_v47 }
 0x10c   :  { %v498_v50 = vpop.f32.mrf.mxu1 }
 0x10d   :  { %569 = vtanh.f32 %v405_v49 }
 0x112   :  { %v562_v52 = vpop.eup %561 }
 0x113   :  { %v413_v53 = vadd.f32 %v562_v52, %v560_v51  ;;  %v564_v54 = vpop.eup %563 }
 0x115   :  { %416 = vst [vmem:[#allocation7] sm:$0xff] %v413_v53 }
 0x116   :  { %v566_v55 = vpop.eup %565 }
 0x117   :  { %v414_v56 = vadd.f32 %v566_v55, %v564_v54  ;;  %v568_v57 = vpop.eup %567 }
 0x119   :  { %417 = vst [vmem:[#allocation7 + $0x8] sm:$0xff] %v414_v56 }
 0x11a   :  { %v570_v58 = vpop.eup %569 }
 0x11b   :  { %v415_v59 = vadd.f32 %v570_v58, %v568_v57 }
 0x11d   :  { %418 = vst [vmem:[#allocation7 + $0x10] sm:$0xff] %v415_v59 }
 0x11e   :  { %622 = shalt.err (!%p619_p0)
}
 0x11f   :  { %s644_s8 = smov 128   ;;  %s645_s9 = smov 8  }
 0x120   :  { %430 = dma.vmem_to_hbm [thread:$0]  %s425_s1, 384, %s693_s4, [#allocation4], %s644_s8, %s644_s8, %s645_s9  }
 0x121   :  { %635 = dma.done.wait [#allocation4], 384  }
 0x122   :  { %636 = vsyncadd [#allocation4], 4294966912 }
 0x123   :  { %434 = vsyncpa [#allocation3], 1 }
 0x124   :  { %435 = vsyncpa [#allocation6], 1 }
 0x125   :  { %436 = vsyncpa [#allocation4], 1 }

</bundles_post_ra>
